<compile_context>
chip_gen: v7x
topology: tpu7x:2x2x1
jax: 0.10.0
libtpu: 0.0.40
codegen_flags: <defaults>
</compile_context>

<pallas_src>
import jax
import jax.numpy as jnp
import numpy as np
from jax.experimental import pallas as pl
from jax.experimental.pallas import tpu as pltpu


def _make_kernel(B, I, H, U, L):
    G = 4 * H

    def kernel(data_ref, w_ref, ret_ref):
        # data_ref: [B, I + 2*L*H + 2*L*U*H]  lane-dense packed small operands
        # w_ref:    [I+H+1, L*4H]             per-layer [W_ih^T ; W_hh^T ; b] blocks
        # ret_ref:  [U, B, H]                 leading-axis full-slab stores
        data = data_ref[...]                                 # one vreg
        w = w_ref[...]                                       # one vreg

        # Static lane-offset slices of the packed operand tile.
        off = 0
        out = data[:, off:off + I]; off += I
        hs = [data[:, off + l * H: off + (l + 1) * H] for l in range(L)]; off += L * H
        cs = [data[:, off + l * H: off + (l + 1) * H] for l in range(L)]; off += L * H
        mh = [[data[:, off + (l * U + u) * H: off + (l * U + u + 1) * H]
               for u in range(U)] for l in range(L)]; off += L * U * H
        mc = [[data[:, off + (l * U + u) * H: off + (l * U + u + 1) * H]
               for u in range(U)] for l in range(L)]

        # Hoisted per-layer weight-row broadcasts (sublane broadcast, done once).
        wx = [[jnp.broadcast_to(w[k:k + 1, l * G:(l + 1) * G], (B, G))
               for k in range(I)] for l in range(L)]
        wh = [[jnp.broadcast_to(w[I + k:I + k + 1, l * G:(l + 1) * G], (B, G))
               for k in range(H)] for l in range(L)]
        wb = [jnp.broadcast_to(w[I + H:I + H + 1, l * G:(l + 1) * G], (B, G))
              for l in range(L)]

        for u in range(U):                                   # static unroll
            for l in range(L):                               # static stack
                # VPU broadcast-FMA lowering of gates = out@Wx + h@Wh + b
                # (I+H = 4 mul-adds per cell, no MXU round-trip latency).
                gates = wb[l]
                for k in range(I):
                    gates = gates + out[:, k:k + 1] * wx[l][k]
                for k in range(H):
                    gates = gates + hs[l][:, k:k + 1] * wh[l][k]

                sig = jax.nn.sigmoid(gates)                  # one EUP issue for i,f,o
                i_g = sig[:, 0 * H:1 * H]
                f_g = sig[:, 1 * H:2 * H]
                o_g = sig[:, 3 * H:4 * H]
                g_g = jnp.tanh(gates[:, 2 * H:3 * H])        # tanh only on g slice

                c_cell = f_g * cs[l] + i_g * g_g
                h_cell = o_g * jnp.tanh(c_cell)

                # Exact convex zoneout blend (bit-exact retention when mask == 1).
                mhl = mh[l][u]
                mcl = mc[l][u]
                hs[l] = mhl * hs[l] + (1.0 - mhl) * h_cell
                cs[l] = mcl * cs[l] + (1.0 - mcl) * c_cell
                out = hs[l]

            ret_ref[u] = out                                 # full-slab leading-axis store

    return kernel


def zoneout_lstm_stacked(x, h0, c0, w_ih, w_hh, b_ih, b_hh, mask_h, mask_c, labels):
    """Forward pass of ZoneoutLSTMStacked.

    x:        [B, I]
    h0, c0:   [L, B, H]
    w_ih:     [L, 4H, I]   (torch LSTMCell layout, gate order i, f, g, o)
    w_hh:     [L, 4H, H]
    b_ih/hh:  [L, 4H]
    mask_h/c: [L, U, B, H] zoneout masks (1 => keep previous state)
    labels:   [B, U, H]
    returns (ret [B, U, H], loss scalar)
    """
    B, I = x.shape
    L, _, H = h0.shape
    U = mask_h.shape[1]
    G = 4 * H

    # Pack all small per-call operands into ONE lane-dense [B, .] tile (1 DMA).
    h_flat = jnp.transpose(h0, (1, 0, 2)).reshape(B, L * H)
    c_flat = jnp.transpose(c0, (1, 0, 2)).reshape(B, L * H)
    mh_flat = jnp.transpose(mask_h, (2, 0, 1, 3)).reshape(B, L * U * H)
    mc_flat = jnp.transpose(mask_c, (2, 0, 1, 3)).reshape(B, L * U * H)
    data = jnp.concatenate([x, h_flat, c_flat, mh_flat, mc_flat], axis=1)  # [B, 26]

    # Fuse weights into ONE [I+H+1, L*4H] tile: per layer [W_ih^T ; W_hh^T ; b].
    w_x = jnp.transpose(w_ih, (0, 2, 1))                     # [L, I, 4H]
    w_h = jnp.transpose(w_hh, (0, 2, 1))                     # [L, H, 4H]
    b = (b_ih + b_hh)[:, None, :]                            # [L, 1, 4H]
    w_layer = jnp.concatenate([w_x, w_h, b], axis=1)         # [L, I+H+1, 4H]
    w_packed = jnp.transpose(w_layer, (1, 0, 2)).reshape(I + H + 1, L * G)  # [5, 16]

    vmem = pl.BlockSpec(memory_space=pltpu.MemorySpace.VMEM)
    ret_ubh = pl.pallas_call(
        _make_kernel(B, I, H, U, L),
        out_shape=jax.ShapeDtypeStruct((U, B, H), jnp.float32),
        in_specs=[vmem, vmem],
        out_specs=vmem,
    )(data, w_packed)

    ret = jnp.transpose(ret_ubh, (1, 0, 2))                  # [B, U, H]
    loss = jnp.mean((ret - labels) ** 2)                     # tiny; XLA fuses with transpose
    return ret, loss


def reference_forward(x, h0, c0, w_ih, w_hh, b_ih, b_hh, mask_h, mask_c, labels):
    """Pure-JAX reference with identical math (correctness check)."""
    L, _, H = h0.shape
    U = mask_h.shape[1]
    out = x
    hs = [h0[l] for l in range(L)]
    cs = [c0[l] for l in range(L)]
    outs = []
    for u in range(U):
        for l in range(L):
            gates = out @ w_ih[l].T + hs[l] @ w_hh[l].T + b_ih[l] + b_hh[l]
            i_g = jax.nn.sigmoid(gates[:, 0 * H:1 * H])
            f_g = jax.nn.sigmoid(gates[:, 1 * H:2 * H])
            g_g = jnp.tanh(gates[:, 2 * H:3 * H])
            o_g = jax.nn.sigmoid(gates[:, 3 * H:4 * H])
            c_cell = f_g * cs[l] + i_g * g_g
            h_cell = o_g * jnp.tanh(c_cell)
            hs[l] = mask_h[l, u] * hs[l] + (1.0 - mask_h[l, u]) * h_cell
            cs[l] = mask_c[l, u] * cs[l] + (1.0 - mask_c[l, u]) * c_cell
            out = hs[l]
        outs.append(out)
    ret = jnp.stack(outs, axis=1)
    loss = jnp.mean((ret - labels) ** 2)
    return ret, loss


if __name__ == "__main__":
    # Module hyper-params (input_size == hidden_size == 2 is hard-coded in the module).
    B, I, H, U, L = 4, 2, 2, 2, 2
    h_zoneout_rate, c_zoneout_rate = 0.5, 0.5

    key = jax.random.PRNGKey(0)
    keys = jax.random.split(key, 10)
    bound = 1.0 / np.sqrt(H)  # torch.nn.LSTMCell default uniform init

    # Deterministic synthetic parameters in torch layout.
    w_ih = jax.random.uniform(keys[0], (L, 4 * H, I), jnp.float32, -bound, bound)
    w_hh = jax.random.uniform(keys[1], (L, 4 * H, H), jnp.float32, -bound, bound)
    b_ih = jax.random.uniform(keys[2], (L, 4 * H), jnp.float32, -bound, bound)
    b_hh = jax.random.uniform(keys[3], (L, 4 * H), jnp.float32, -bound, bound)

    # Deterministic zoneout masks (module draws them with bernoulli at __init__).
    mask_h = jax.random.bernoulli(keys[4], h_zoneout_rate, (L, U, B, H)).astype(jnp.float32)
    mask_c = jax.random.bernoulli(keys[5], c_zoneout_rate, (L, U, B, H)).astype(jnp.float32)

    # Forward inputs: inputs = [x, h0_0, c0_0, h0_1, c0_1], labels = [labels0].
    x = jax.random.normal(keys[6], (B, I), jnp.float32)
    h0 = jax.random.normal(keys[7], (L, B, H), jnp.float32)
    c0 = jax.random.normal(keys[8], (L, B, H), jnp.float32)
    labels = jax.random.normal(keys[9], (B, U, H), jnp.float32)

    fwd = jax.jit(zoneout_lstm_stacked)
    ret, loss = fwd(x, h0, c0, w_ih, w_hh, b_ih, b_hh, mask_h, mask_c, labels)
    jax.block_until_ready((ret, loss))

    ret_ref, loss_ref = reference_forward(x, h0, c0, w_ih, w_hh, b_ih, b_hh,
                                          mask_h, mask_c, labels)
    np.testing.assert_allclose(np.asarray(ret), np.asarray(ret_ref), rtol=1e-5, atol=1e-5)
    np.testing.assert_allclose(float(loss), float(loss_ref), rtol=1e-5, atol=1e-5)

    print("KERNEL_OK")
</pallas_src>

<mosaic_0001>
module attributes {stable_mosaic.version = 11 : i64} {
  func.func @kernel(%arg0: memref<4x26xf32, #tpu.memory_space<vmem>>, %arg1: memref<5x16xf32, #tpu.memory_space<vmem>>, %arg2: memref<2x4x2xf32, #tpu.memory_space<vmem>>) attributes {dimension_semantics = [], scalar_prefetch = 0 : i64, scratch_operands = 0 : i64, tpu.core_type = #tpu.core_type<tc>} {
    %c0 = arith.constant 0 : index
    %c0_0 = arith.constant 0 : index
    %0 = vector.load %arg0[%c0, %c0_0] : memref<4x26xf32, #tpu.memory_space<vmem>>, vector<4x26xf32>
    %c0_1 = arith.constant 0 : index
    %c0_2 = arith.constant 0 : index
    %1 = vector.load %arg1[%c0_1, %c0_2] : memref<5x16xf32, #tpu.memory_space<vmem>>, vector<5x16xf32>
    %2 = vector.extract_strided_slice %0 {offsets = [0, 0], sizes = [4, 2], strides = [1, 1]} : vector<4x26xf32> to vector<4x2xf32>
    %3 = vector.extract_strided_slice %0 {offsets = [0, 2], sizes = [4, 2], strides = [1, 1]} : vector<4x26xf32> to vector<4x2xf32>
    %4 = vector.extract_strided_slice %0 {offsets = [0, 4], sizes = [4, 2], strides = [1, 1]} : vector<4x26xf32> to vector<4x2xf32>
    %5 = vector.extract_strided_slice %0 {offsets = [0, 6], sizes = [4, 2], strides = [1, 1]} : vector<4x26xf32> to vector<4x2xf32>
    %6 = vector.extract_strided_slice %0 {offsets = [0, 8], sizes = [4, 2], strides = [1, 1]} : vector<4x26xf32> to vector<4x2xf32>
    %7 = vector.extract_strided_slice %0 {offsets = [0, 10], sizes = [4, 2], strides = [1, 1]} : vector<4x26xf32> to vector<4x2xf32>
    %8 = vector.extract_strided_slice %0 {offsets = [0, 12], sizes = [4, 2], strides = [1, 1]} : vector<4x26xf32> to vector<4x2xf32>
    %9 = vector.extract_strided_slice %0 {offsets = [0, 14], sizes = [4, 2], strides = [1, 1]} : vector<4x26xf32> to vector<4x2xf32>
    %10 = vector.extract_strided_slice %0 {offsets = [0, 16], sizes = [4, 2], strides = [1, 1]} : vector<4x26xf32> to vector<4x2xf32>
    %11 = vector.extract_strided_slice %0 {offsets = [0, 18], sizes = [4, 2], strides = [1, 1]} : vector<4x26xf32> to vector<4x2xf32>
    %12 = vector.extract_strided_slice %0 {offsets = [0, 22], sizes = [4, 2], strides = [1, 1]} : vector<4x26xf32> to vector<4x2xf32>
    %13 = vector.extract_strided_slice %1 {offsets = [0, 0], sizes = [1, 8], strides = [1, 1]} : vector<5x16xf32> to vector<1x8xf32>
    %14 = vector.shape_cast %13 : vector<1x8xf32> to vector<1x8xf32>
    %15 = vector.broadcast %14 : vector<1x8xf32> to vector<4x8xf32>
    %16 = vector.extract_strided_slice %1 {offsets = [1, 0], sizes = [1, 8], strides = [1, 1]} : vector<5x16xf32> to vector<1x8xf32>
    %17 = vector.shape_cast %16 : vector<1x8xf32> to vector<1x8xf32>
    %18 = vector.broadcast %17 : vector<1x8xf32> to vector<4x8xf32>
    %19 = vector.extract_strided_slice %1 {offsets = [0, 8], sizes = [1, 8], strides = [1, 1]} : vector<5x16xf32> to vector<1x8xf32>
    %20 = vector.shape_cast %19 : vector<1x8xf32> to vector<1x8xf32>
    %21 = vector.broadcast %20 : vector<1x8xf32> to vector<4x8xf32>
    %22 = vector.extract_strided_slice %1 {offsets = [1, 8], sizes = [1, 8], strides = [1, 1]} : vector<5x16xf32> to vector<1x8xf32>
    %23 = vector.shape_cast %22 : vector<1x8xf32> to vector<1x8xf32>
    %24 = vector.broadcast %23 : vector<1x8xf32> to vector<4x8xf32>
    %25 = vector.extract_strided_slice %1 {offsets = [2, 0], sizes = [1, 8], strides = [1, 1]} : vector<5x16xf32> to vector<1x8xf32>
    %26 = vector.shape_cast %25 : vector<1x8xf32> to vector<1x8xf32>
    %27 = vector.broadcast %26 : vector<1x8xf32> to vector<4x8xf32>
    %28 = vector.extract_strided_slice %1 {offsets = [3, 0], sizes = [1, 8], strides = [1, 1]} : vector<5x16xf32> to vector<1x8xf32>
    %29 = vector.shape_cast %28 : vector<1x8xf32> to vector<1x8xf32>
    %30 = vector.broadcast %29 : vector<1x8xf32> to vector<4x8xf32>
    %31 = vector.extract_strided_slice %1 {offsets = [2, 8], sizes = [1, 8], strides = [1, 1]} : vector<5x16xf32> to vector<1x8xf32>
    %32 = vector.shape_cast %31 : vector<1x8xf32> to vector<1x8xf32>
    %33 = vector.broadcast %32 : vector<1x8xf32> to vector<4x8xf32>
    %34 = vector.extract_strided_slice %1 {offsets = [3, 8], sizes = [1, 8], strides = [1, 1]} : vector<5x16xf32> to vector<1x8xf32>
    %35 = vector.shape_cast %34 : vector<1x8xf32> to vector<1x8xf32>
    %36 = vector.broadcast %35 : vector<1x8xf32> to vector<4x8xf32>
    %37 = vector.extract_strided_slice %1 {offsets = [4, 0], sizes = [1, 8], strides = [1, 1]} : vector<5x16xf32> to vector<1x8xf32>
    %38 = vector.shape_cast %37 : vector<1x8xf32> to vector<1x8xf32>
    %39 = vector.broadcast %38 : vector<1x8xf32> to vector<4x8xf32>
    %40 = vector.extract_strided_slice %1 {offsets = [4, 8], sizes = [1, 8], strides = [1, 1]} : vector<5x16xf32> to vector<1x8xf32>
    %41 = vector.shape_cast %40 : vector<1x8xf32> to vector<1x8xf32>
    %42 = vector.broadcast %41 : vector<1x8xf32> to vector<4x8xf32>
    %43 = vector.extract_strided_slice %2 {offsets = [0, 0], sizes = [4, 1], strides = [1, 1]} : vector<4x2xf32> to vector<4x1xf32>
    %44 = vector.broadcast %43 : vector<4x1xf32> to vector<4x8xf32>
    %45 = arith.mulf %44, %15 : vector<4x8xf32>
    %46 = arith.addf %39, %45 : vector<4x8xf32>
    %47 = vector.extract_strided_slice %2 {offsets = [0, 1], sizes = [4, 1], strides = [1, 1]} : vector<4x2xf32> to vector<4x1xf32>
    %48 = vector.broadcast %47 : vector<4x1xf32> to vector<4x8xf32>
    %49 = arith.mulf %48, %18 : vector<4x8xf32>
    %50 = arith.addf %46, %49 : vector<4x8xf32>
    %51 = vector.extract_strided_slice %3 {offsets = [0, 0], sizes = [4, 1], strides = [1, 1]} : vector<4x2xf32> to vector<4x1xf32>
    %52 = vector.broadcast %51 : vector<4x1xf32> to vector<4x8xf32>
    %53 = arith.mulf %52, %27 : vector<4x8xf32>
    %54 = arith.addf %50, %53 : vector<4x8xf32>
    %55 = vector.extract_strided_slice %3 {offsets = [0, 1], sizes = [4, 1], strides = [1, 1]} : vector<4x2xf32> to vector<4x1xf32>
    %56 = vector.broadcast %55 : vector<4x1xf32> to vector<4x8xf32>
    %57 = arith.mulf %56, %30 : vector<4x8xf32>
    %58 = arith.addf %54, %57 : vector<4x8xf32>
    %59 = arith.negf %58 : vector<4x8xf32>
    %60 = math.exp %59 : vector<4x8xf32>
    %cst = arith.constant 1.000000e+00 : f32
    %61 = vector.broadcast %cst : f32 to vector<4x8xf32>
    %62 = arith.addf %61, %60 : vector<4x8xf32>
    %63 = arith.divf %61, %62 : vector<4x8xf32>
    %64 = vector.extract_strided_slice %63 {offsets = [0, 0], sizes = [4, 2], strides = [1, 1]} : vector<4x8xf32> to vector<4x2xf32>
    %65 = vector.extract_strided_slice %63 {offsets = [0, 2], sizes = [4, 2], strides = [1, 1]} : vector<4x8xf32> to vector<4x2xf32>
    %66 = vector.extract_strided_slice %63 {offsets = [0, 6], sizes = [4, 2], strides = [1, 1]} : vector<4x8xf32> to vector<4x2xf32>
    %67 = vector.extract_strided_slice %58 {offsets = [0, 4], sizes = [4, 2], strides = [1, 1]} : vector<4x8xf32> to vector<4x2xf32>
    %68 = math.tanh %67 : vector<4x2xf32>
    %69 = arith.mulf %65, %5 : vector<4x2xf32>
    %70 = arith.mulf %64, %68 : vector<4x2xf32>
    %71 = arith.addf %69, %70 : vector<4x2xf32>
    %72 = math.tanh %71 : vector<4x2xf32>
    %73 = arith.mulf %66, %72 : vector<4x2xf32>
    %74 = arith.mulf %7, %3 : vector<4x2xf32>
    %cst_3 = arith.constant 1.000000e+00 : f32
    %75 = vector.broadcast %cst_3 : f32 to vector<4x2xf32>
    %76 = arith.subf %75, %7 : vector<4x2xf32>
    %77 = arith.mulf %76, %73 : vector<4x2xf32>
    %78 = arith.addf %74, %77 : vector<4x2xf32>
    %79 = arith.mulf %11, %5 : vector<4x2xf32>
    %cst_4 = arith.constant 1.000000e+00 : f32
    %80 = vector.broadcast %cst_4 : f32 to vector<4x2xf32>
    %81 = arith.subf %80, %11 : vector<4x2xf32>
    %82 = arith.mulf %81, %71 : vector<4x2xf32>
    %83 = arith.addf %79, %82 : vector<4x2xf32>
    %84 = vector.extract_strided_slice %78 {offsets = [0, 0], sizes = [4, 1], strides = [1, 1]} : vector<4x2xf32> to vector<4x1xf32>
    %85 = vector.broadcast %84 : vector<4x1xf32> to vector<4x8xf32>
    %86 = arith.mulf %85, %21 : vector<4x8xf32>
    %87 = arith.addf %42, %86 : vector<4x8xf32>
    %88 = vector.extract_strided_slice %78 {offsets = [0, 1], sizes = [4, 1], strides = [1, 1]} : vector<4x2xf32> to vector<4x1xf32>
    %89 = vector.broadcast %88 : vector<4x1xf32> to vector<4x8xf32>
    %90 = arith.mulf %89, %24 : vector<4x8xf32>
    %91 = arith.addf %87, %90 : vector<4x8xf32>
    %92 = vector.extract_strided_slice %4 {offsets = [0, 0], sizes = [4, 1], strides = [1, 1]} : vector<4x2xf32> to vector<4x1xf32>
    %93 = vector.broadcast %92 : vector<4x1xf32> to vector<4x8xf32>
    %94 = arith.mulf %93, %33 : vector<4x8xf32>
    %95 = arith.addf %91, %94 : vector<4x8xf32>
    %96 = vector.extract_strided_slice %4 {offsets = [0, 1], sizes = [4, 1], strides = [1, 1]} : vector<4x2xf32> to vector<4x1xf32>
    %97 = vector.broadcast %96 : vector<4x1xf32> to vector<4x8xf32>
    %98 = arith.mulf %97, %36 : vector<4x8xf32>
    %99 = arith.addf %95, %98 : vector<4x8xf32>
    %100 = arith.negf %99 : vector<4x8xf32>
    %101 = math.exp %100 : vector<4x8xf32>
    %cst_5 = arith.constant 1.000000e+00 : f32
    %102 = vector.broadcast %cst_5 : f32 to vector<4x8xf32>
    %103 = arith.addf %102, %101 : vector<4x8xf32>
    %104 = arith.divf %102, %103 : vector<4x8xf32>
    %105 = vector.extract_strided_slice %104 {offsets = [0, 0], sizes = [4, 2], strides = [1, 1]} : vector<4x8xf32> to vector<4x2xf32>
    %106 = vector.extract_strided_slice %104 {offsets = [0, 2], sizes = [4, 2], strides = [1, 1]} : vector<4x8xf32> to vector<4x2xf32>
    %107 = vector.extract_strided_slice %104 {offsets = [0, 6], sizes = [4, 2], strides = [1, 1]} : vector<4x8xf32> to vector<4x2xf32>
    %108 = vector.extract_strided_slice %99 {offsets = [0, 4], sizes = [4, 2], strides = [1, 1]} : vector<4x8xf32> to vector<4x2xf32>
    %109 = math.tanh %108 : vector<4x2xf32>
    %110 = arith.mulf %106, %6 : vector<4x2xf32>
    %111 = arith.mulf %105, %109 : vector<4x2xf32>
    %112 = arith.addf %110, %111 : vector<4x2xf32>
    %113 = math.tanh %112 : vector<4x2xf32>
    %114 = arith.mulf %107, %113 : vector<4x2xf32>
    %115 = arith.mulf %9, %4 : vector<4x2xf32>
    %cst_6 = arith.constant 1.000000e+00 : f32
    %116 = vector.broadcast %cst_6 : f32 to vector<4x2xf32>
    %117 = arith.subf %116, %9 : vector<4x2xf32>
    %118 = arith.mulf %117, %114 : vector<4x2xf32>
    %119 = arith.addf %115, %118 : vector<4x2xf32>
    %120 = arith.mulf %12, %6 : vector<4x2xf32>
    %cst_7 = arith.constant 1.000000e+00 : f32
    %121 = vector.broadcast %cst_7 : f32 to vector<4x2xf32>
    %122 = arith.subf %121, %12 : vector<4x2xf32>
    %123 = arith.mulf %122, %112 : vector<4x2xf32>
    %124 = arith.addf %120, %123 : vector<4x2xf32>
    %c0_8 = arith.constant 0 : index
    %c0_9 = arith.constant 0 : index
    %c0_10 = arith.constant 0 : index
    %125 = vector.load %arg2[%c0_8, %c0_9, %c0_10] : memref<2x4x2xf32, #tpu.memory_space<vmem>>, vector<1x4x2xf32>
    %126 = vector.shape_cast %125 : vector<1x4x2xf32> to vector<4x2xf32>
    %127 = vector.shape_cast %119 : vector<4x2xf32> to vector<1x4x2xf32>
    tpu.vector_store %arg2[%c0_8, %c0_9, %c0_10], %127 {strides = array<i32>} : memref<2x4x2xf32, #tpu.memory_space<vmem>>, vector<1x4x2xf32>,
    %128 = vector.extract_strided_slice %119 {offsets = [0, 0], sizes = [4, 1], strides = [1, 1]} : vector<4x2xf32> to vector<4x1xf32>
    %129 = vector.broadcast %128 : vector<4x1xf32> to vector<4x8xf32>
    %130 = arith.mulf %129, %15 : vector<4x8xf32>
    %131 = arith.addf %39, %130 : vector<4x8xf32>
    %132 = vector.extract_strided_slice %119 {offsets = [0, 1], sizes = [4, 1], strides = [1, 1]} : vector<4x2xf32> to vector<4x1xf32>
    %133 = vector.broadcast %132 : vector<4x1xf32> to vector<4x8xf32>
    %134 = arith.mulf %133, %18 : vector<4x8xf32>
    %135 = arith.addf %131, %134 : vector<4x8xf32>
    %136 = vector.extract_strided_slice %78 {offsets = [0, 0], sizes = [4, 1], strides = [1, 1]} : vector<4x2xf32> to vector<4x1xf32>
    %137 = vector.broadcast %136 : vector<4x1xf32> to vector<4x8xf32>
    %138 = arith.mulf %137, %27 : vector<4x8xf32>
    %139 = arith.addf %135, %138 : vector<4x8xf32>
    %140 = vector.extract_strided_slice %78 {offsets = [0, 1], sizes = [4, 1], strides = [1, 1]} : vector<4x2xf32> to vector<4x1xf32>
    %141 = vector.broadcast %140 : vector<4x1xf32> to vector<4x8xf32>
    %142 = arith.mulf %141, %30 : vector<4x8xf32>
    %143 = arith.addf %139, %142 : vector<4x8xf32>
    %144 = arith.negf %143 : vector<4x8xf32>
    %145 = math.exp %144 : vector<4x8xf32>
    %cst_11 = arith.constant 1.000000e+00 : f32
    %146 = vector.broadcast %cst_11 : f32 to vector<4x8xf32>
    %147 = arith.addf %146, %145 : vector<4x8xf32>
    %148 = arith.divf %146, %147 : vector<4x8xf32>
    %149 = vector.extract_strided_slice %148 {offsets = [0, 0], sizes = [4, 2], strides = [1, 1]} : vector<4x8xf32> to vector<4x2xf32>
    %150 = vector.extract_strided_slice %148 {offsets = [0, 2], sizes = [4, 2], strides = [1, 1]} : vector<4x8xf32> to vector<4x2xf32>
    %151 = vector.extract_strided_slice %148 {offsets = [0, 6], sizes = [4, 2], strides = [1, 1]} : vector<4x8xf32> to vector<4x2xf32>
    %152 = vector.extract_strided_slice %143 {offsets = [0, 4], sizes = [4, 2], strides = [1, 1]} : vector<4x8xf32> to vector<4x2xf32>
    %153 = math.tanh %152 : vector<4x2xf32>
    %154 = arith.mulf %150, %83 : vector<4x2xf32>
    %155 = arith.mulf %149, %153 : vector<4x2xf32>
    %156 = arith.addf %154, %155 : vector<4x2xf32>
    %157 = math.tanh %156 : vector<4x2xf32>
    %158 = arith.mulf %151, %157 : vector<4x2xf32>
    %159 = arith.mulf %8, %78 : vector<4x2xf32>
    %cst_12 = arith.constant 1.000000e+00 : f32
    %160 = vector.broadcast %cst_12 : f32 to vector<4x2xf32>
    %161 = arith.subf %160, %8 : vector<4x2xf32>
    %162 = arith.mulf %161, %158 : vector<4x2xf32>
    %163 = arith.addf %159, %162 : vector<4x2xf32>
    %164 = vector.extract_strided_slice %163 {offsets = [0, 0], sizes = [4, 1], strides = [1, 1]} : vector<4x2xf32> to vector<4x1xf32>
    %165 = vector.broadcast %164 : vector<4x1xf32> to vector<4x8xf32>
    %166 = arith.mulf %165, %21 : vector<4x8xf32>
    %167 = arith.addf %42, %166 : vector<4x8xf32>
    %168 = vector.extract_strided_slice %163 {offsets = [0, 1], sizes = [4, 1], strides = [1, 1]} : vector<4x2xf32> to vector<4x1xf32>
    %169 = vector.broadcast %168 : vector<4x1xf32> to vector<4x8xf32>
    %170 = arith.mulf %169, %24 : vector<4x8xf32>
    %171 = arith.addf %167, %170 : vector<4x8xf32>
    %172 = vector.extract_strided_slice %119 {offsets = [0, 0], sizes = [4, 1], strides = [1, 1]} : vector<4x2xf32> to vector<4x1xf32>
    %173 = vector.broadcast %172 : vector<4x1xf32> to vector<4x8xf32>
    %174 = arith.mulf %173, %33 : vector<4x8xf32>
    %175 = arith.addf %171, %174 : vector<4x8xf32>
    %176 = vector.extract_strided_slice %119 {offsets = [0, 1], sizes = [4, 1], strides = [1, 1]} : vector<4x2xf32> to vector<4x1xf32>
    %177 = vector.broadcast %176 : vector<4x1xf32> to vector<4x8xf32>
    %178 = arith.mulf %177, %36 : vector<4x8xf32>
    %179 = arith.addf %175, %178 : vector<4x8xf32>
    %180 = arith.negf %179 : vector<4x8xf32>
    %181 = math.exp %180 : vector<4x8xf32>
    %cst_13 = arith.constant 1.000000e+00 : f32
    %182 = vector.broadcast %cst_13 : f32 to vector<4x8xf32>
    %183 = arith.addf %182, %181 : vector<4x8xf32>
    %184 = arith.divf %182, %183 : vector<4x8xf32>
    %185 = vector.extract_strided_slice %184 {offsets = [0, 0], sizes = [4, 2], strides = [1, 1]} : vector<4x8xf32> to vector<4x2xf32>
    %186 = vector.extract_strided_slice %184 {offsets = [0, 2], sizes = [4, 2], strides = [1, 1]} : vector<4x8xf32> to vector<4x2xf32>
    %187 = vector.extract_strided_slice %184 {offsets = [0, 6], sizes = [4, 2], strides = [1, 1]} : vector<4x8xf32> to vector<4x2xf32>
    %188 = vector.extract_strided_slice %179 {offsets = [0, 4], sizes = [4, 2], strides = [1, 1]} : vector<4x8xf32> to vector<4x2xf32>
    %189 = math.tanh %188 : vector<4x2xf32>
    %190 = arith.mulf %186, %124 : vector<4x2xf32>
    %191 = arith.mulf %185, %189 : vector<4x2xf32>
    %192 = arith.addf %190, %191 : vector<4x2xf32>
    %193 = math.tanh %192 : vector<4x2xf32>
    %194 = arith.mulf %187, %193 : vector<4x2xf32>
    %195 = arith.mulf %10, %119 : vector<4x2xf32>
    %cst_14 = arith.constant 1.000000e+00 : f32
    %196 = vector.broadcast %cst_14 : f32 to vector<4x2xf32>
    %197 = arith.subf %196, %10 : vector<4x2xf32>
    %198 = arith.mulf %197, %194 : vector<4x2xf32>
    %199 = arith.addf %195, %198 : vector<4x2xf32>
    %c1 = arith.constant 1 : index
    %c0_15 = arith.constant 0 : index
    %c0_16 = arith.constant 0 : index
    %200 = vector.load %arg2[%c1, %c0_15, %c0_16] : memref<2x4x2xf32, #tpu.memory_space<vmem>>, vector<1x4x2xf32>
    %201 = vector.shape_cast %200 : vector<1x4x2xf32> to vector<4x2xf32>
    %202 = vector.shape_cast %199 : vector<4x2xf32> to vector<1x4x2xf32>
    tpu.vector_store %arg2[%c1, %c0_15, %c0_16], %202 {strides = array<i32>} : memref<2x4x2xf32, #tpu.memory_space<vmem>>, vector<1x4x2xf32>,
    return
  }
}

</mosaic_0001>

<bundles_post_ra>
// kernel: zoneout_lstm_stacked.1
= control target key start
LH: loop header
LB: loop body
LE: loop exit
PB: predicated region body
PF: predicated region fallthrough
CT: control target
= control target key end

     0   :  { %v373_v0 = vmov 0   ;;  %v374_v2 = vmov 2   ;;  %v375_v3 = vmov 1   ;;  %v376_v4 = vmov 3   ;;  %s377_s11 = smov 124   ;;  %s379_s13 = smov 8   ;;  %s528_s0 = inlined_call_operand.vmem [shape: f32[4,26], index: 0, kind: input, shape index: {}]   ;;  %s529_s1 = inlined_call_operand.vmem [shape: f32[5,16], index: 1, kind: input, shape index: {}]   ;;  %s530_s2 = inlined_call_operand.vmem [shape: f32[2,4,2], index: 2, kind: output, shape index: {}]  }
   0x1   :  { %328 = vset.pattern.permute.xlu0 %v373_v0  ;;  %v415_v1 = vld [vmem:[%s528_s0] sm:$0xf]  ;;  %330 = vset.pattern.permute.xlu1 %v374_v2  ;;  %v13_v5 = vlaneseq  ;;  %s380_s14 = smov 4   ;;  %v381_v42 = vmov 10   ;;  %v382_v43 = vmov 11   ;;  %v383_v52 = vmov 4  }
   0x2   :  { %35 = vperm.xlu0 %328, %v415_v1   ;;  %47 = vperm.xlu1 %330, %v415_v1   ;;  %v12_v8 = vld [vmem:[%s529_s1] sm:$0x1f]  ;;  %s378_s1 = smov 2   ;;  %v450_v47 = vsub.f32 1.0, %v415_v1  ;;  %v384_v53 = vmov 5   ;;  %s385_s15 = smov 10  }
   0x3   :  { %v14_v6 = vshrl.u32 %v13_v5, 7  ;;  %s388_s16 = smov 12   ;;  %s389_s17 = smov 16   ;;  %vm178_vm0 = vcmask 11264  }
   0x4   :  { %s390_s18 = smov 112   ;;  %s393_s19 = smov 6  }
   0x5   :  { %v15_v7 = vsub.s32 0, %v14_v6  ;;  %v31_v10 = vsub.s32 4, %v14_v6  ;;  %v19_v11 = vsub.s32 1, %v14_v6  ;;  %v23_v13 = vsub.s32 2, %v14_v6  ;;  %s394_s20 = smov 14   ;;  %s395_s21 = smov 116  }
   0x6   :  { %329 = vset.pattern.permute.xlu0 %v375_v3  ;;  %331 = vset.pattern.permute.xlu1 %v376_v4  ;;  %v27_v15 = vsub.s32 3, %v14_v6  ;;  %s396_s22 = smov 114  }
   0x7   :  { %41 = vperm.xlu0 %329, %v415_v1   ;;  %53 = vperm.xlu1 %331, %v415_v1   ;;  %v426_v9 = vrot.slane %v12_v8, %v15_v7  ;;  %v428_v16 = vrot.slane %v12_v8, %v31_v10  ;;  %v431_v18 = vrot.slane %v12_v8, %v19_v11 }
   0x8   :  { %v433_v19 = vrot.slane %v12_v8, %v23_v13  ;;  %v435_v20 = vrot.slane %v12_v8, %v27_v15  ;;  %v386_v15 = vmov 15  }
   0xb   :  { %65 = vrot.lane.b32.xlu0 %v415_v1, %s377_s11  ;;  %332 = vset.pattern.permute.xlu1 %v381_v42 }
   0xc   :  { %333 = vset.pattern.permute.xlu0 %v382_v43 }
  0x81   :  { %v36_v12 = vpop.permute.xlu0 %35  ;;  %v48_v14 = vpop.permute.xlu1 %47 }
  0x82   :  { %v38_v17 = vmul.f32 %v36_v12, %v426_v9  ;;  %v50_v25 = vmul.f32 %v48_v14, %v433_v19 }
  0x84   :  { %v39_v23 = vadd.f32 %v38_v17, %v428_v16  ;;  %v387_v17 = vmov 14  }
  0x86   :  { %v42_v21 = vpop.permute.xlu0 %41  ;;  %v54_v22 = vpop.permute.xlu1 %53 }
  0x87   :  { %v44_v24 = vmul.f32 %v42_v21, %v431_v18  ;;  %v56_v27 = vmul.f32 %v54_v22, %v435_v20 }
  0x89   :  { %v45_v26 = vadd.f32 %v44_v24, %v39_v23 }
  0x8a   :  { %v66_v37 = vpop.permute.xlu0 %65 }
  0x8b   :  { %v51_v28 = vadd.f32 %v50_v25, %v45_v26 }
  0x8d   :  { %v57_v29 = vadd.f32 %v56_v27, %v51_v28 }
  0x8f   :  { %341 = vtanh.f32 %v57_v29  ;;  %v299_v31 = vmul.f32 -1.442695, %v57_v29 }
  0x91   :  { %343 = vpow2.f32 %v299_v31 }
  0x99   :  { %v342_v30 = vpop.eup %341 }
  0x9a   :  { %70 = vrot.lane.b32.xlu1 %v342_v30, %s377_s11 }
  0x9b   :  { %v344_v32 = vpop.eup %343 }
  0x9c   :  { %v61_v33 = vadd.f32 1.0, %v344_v32 }
  0x9e   :  { %345 = vrcp.f32 %v61_v33 }
  0xa8   :  { %v346_v34 = vpop.eup %345 }
  0xa9   :  { %v68_v38 = vmul.f32 %v346_v34, %v66_v37 }
 0x10c   :  { %v71_v35 = vpop.permute.xlu1 %70 }
 0x10d   :  { %v73_v36 = vmul.f32 %v346_v34, %v71_v35 }
 0x10f   :  { %75 = vrot.lane.b32.xlu1 %v73_v36, %s378_s1 }
 0x113   :  { %85 = vrot.lane.b32.xlu1 %v415_v1, %s379_s13 }
 0x181   :  { %v76_v39 = vpop.permute.xlu1 %75 }
 0x182   :  { %v443_v40 = vadd.f32 %v76_v39, %v68_v38 }
 0x184   :  { %347 = vtanh.f32 %v443_v40 }
 0x185   :  { %v86_v46 = vpop.permute.xlu1 %85 }
 0x186   :  { %v88_v48 = vmul.f32 %v86_v46, %v415_v1 }
 0x18e   :  { %v348_v41 = vpop.eup %347 }
 0x18f   :  { %81 = vrot.lane.b32.xlu0 %v348_v41, %s380_s14 }
 0x201   :  { %v82_v44 = vpop.permute.xlu0 %81 }
 0x202   :  { %v84_v45 = vmul.f32 %v346_v34, %v82_v44 }
 0x204   :  { %91 = vrot.lane.b32.xlu0 %v84_v45, %s380_s14 }
 0x276   :  { %v92_v49 = vpop.permute.xlu0 %91 }
 0x277   :  { %v94_v50 = vmul.f32 %v92_v49, %v450_v47 }
 0x279   :  { %v454_v51 = vadd.f32 %v94_v50, %v88_v48 }
 0x27b   :  { %114 = vperm.xlu0 %333, %v454_v51   ;;  %108 = vperm.xlu1 %332, %v454_v51  }
 0x27f   :  { %334 = vset.pattern.permute.xlu1 %v383_v52  ;;  %337 = vset.pattern.permute.xlu0 %v386_v15 }
 0x280   :  { %120 = vperm.xlu1 %334, %v415_v1  }
 0x284   :  { %335 = vset.pattern.permute.xlu1 %v384_v53 }
 0x285   :  { %126 = vperm.xlu1 %335, %v415_v1  }
 0x289   :  { %138 = vrot.lane.b32.xlu1 %v415_v1, %s378_s1 }
 0x28a   :  { %336 = vset.pattern.permute.xlu1 %v387_v17 }
 0x2fa   :  { %v109_v54 = vpop.permute.xlu1 %108  ;;  %v115_v56 = vpop.permute.xlu0 %114 }
 0x2fb   :  { %v111_v55 = vmul.f32 %v109_v54, %v426_v9  ;;  %v117_v58 = vmul.f32 %v115_v56, %v431_v18  ;;  %v192_v34 = vmul.f32 %v109_v54, %v433_v19  ;;  %v194_v36 = vmul.f32 %v115_v56, %v435_v20 }
 0x2fd   :  { %v112_v57 = vadd.f32 %v111_v55, %v428_v16 }
 0x2ff   :  { %v121_v59 = vpop.permute.xlu1 %120  ;;  %v118_v60 = vadd.f32 %v117_v58, %v112_v57  ;;  %v391_v57 = vmov 12   ;;  %v392_v58 = vmov 13  }
 0x300   :  { %v123_v61 = vmul.f32 %v121_v59, %v433_v19 }
 0x302   :  { %v124_v63 = vadd.f32 %v123_v61, %v118_v60 }
 0x304   :  { %v127_v62 = vpop.permute.xlu1 %126 }
 0x305   :  { %v129_v0 = vmul.f32 %v127_v62, %v435_v20 }
 0x307   :  { %v130_v2 = vadd.f32 %v129_v0, %v124_v63 }
 0x308   :  { %v139_v11 = vpop.permute.xlu1 %138 }
 0x309   :  { %349 = vtanh.f32 %v130_v2  ;;  %v300_v4 = vmul.f32 -1.442695, %v130_v2 }
 0x30b   :  { %351 = vpow2.f32 %v300_v4 }
 0x313   :  { %v350_v3 = vpop.eup %349 }
 0x314   :  { %143 = vrot.lane.b32.xlu0 %v350_v3, %s377_s11 }
 0x315   :  { %v352_v5 = vpop.eup %351 }
 0x316   :  { %v134_v6 = vadd.f32 1.0, %v352_v5 }
 0x318   :  { %353 = vrcp.f32 %v134_v6 }
 0x322   :  { %v354_v7 = vpop.eup %353 }
 0x323   :  { %v141_v12 = vmul.f32 %v354_v7, %v139_v11 }
 0x386   :  { %v144_v8 = vpop.permute.xlu0 %143 }
 0x387   :  { %v146_v10 = vmul.f32 %v354_v7, %v144_v8 }
 0x389   :  { %148 = vrot.lane.b32.xlu0 %v146_v10, %s378_s1 }
 0x38d   :  { %158 = vrot.lane.b32.xlu0 %v415_v1, %s385_s15 }
 0x3fb   :  { %v149_v13 = vpop.permute.xlu0 %148 }
 0x3fc   :  { %v470_v14 = vadd.f32 %v149_v13, %v141_v12 }
 0x3fe   :  { %355 = vtanh.f32 %v470_v14 }
 0x3ff   :  { %v159_v22 = vpop.permute.xlu0 %158 }
 0x400   :  { %v161_v25 = vmul.f32 %v159_v22, %v415_v1 }
 0x408   :  { %v356_v21 = vpop.eup %355 }
 0x409   :  { %154 = vrot.lane.b32.xlu1 %v356_v21, %s380_s14 }
 0x47b   :  { %v155_v23 = vpop.permute.xlu1 %154 }
 0x47c   :  { %v157_v24 = vmul.f32 %v354_v7, %v155_v23 }
 0x47e   :  { %v162_v26 = vmul.f32 %v157_v24, %v450_v47 }
 0x480   :  { %v476_v27 = vadd.f32 %v162_v26, %v161_v25 }
 0x482   :  { %187 = vperm.xlu0 %337, %v476_v27   ;;  %181 = vperm.xlu1 %336, %v476_v27  }
 0x486   :  { %96 = vrot.lane.b32.xlu1 %v415_v1, %s388_s16  ;;  %338 = vset.pattern.permute.xlu0 %v391_v57 }
 0x487   :  { %339 = vset.pattern.permute.xlu1 %v392_v58 }
 0x48a   :  { %101 = vrot.lane.b32.xlu1 %v443_v40, %s389_s17 }
 0x501   :  { %v483_v28 = vpop.permute.xlu0 %187  ;;  %v182_v29 = vpop.permute.xlu1 %181 }
 0x502   :  { %v184_v30 = vmul.f32 %v182_v29, %v426_v9  ;;  %v190_v31 = vmul.f32 %v483_v28, %v431_v18  ;;  %v247_v10 = vmul.f32 %v182_v29, %v433_v19 }
 0x504   :  { %v185_v32 = vadd.f32 %v184_v30, %v428_v16 }
 0x505   :  { %v97_v33 = vpop.permute.xlu1 %96 }
 0x506   :  { %v191_v35 = vadd.f32 %v190_v31, %v185_v32  ;;  %v99_v38 = vmul.f32 %v97_v33, %v415_v1 }
 0x508   :  { %v193_v37 = vadd.f32 %v192_v34, %v191_v35 }
 0x509   :  { %v102_v39 = vpop.permute.xlu1 %101 }
 0x50a   :  { %v195_v40 = vadd.f32 %v194_v36, %v193_v37  ;;  %v104_v41 = vmul.f32 %v102_v39, %v450_v47 }
 0x50c   :  { %357 = vtanh.f32 %v195_v40  ;;  %v105_v42 = vadd.f32 %v104_v41, %v99_v38  ;;  %v301_v44 = vmul.f32 -1.442695, %v195_v40 }
 0x50e   :  { %204 = vrot.lane.b32.xlu1 %v105_v42, %s390_s18  ;;  %359 = vpow2.f32 %v301_v44 }
 0x516   :  { %v358_v43 = vpop.eup %357 }
 0x517   :  { %209 = vrot.lane.b32.xlu0 %v358_v43, %s377_s11 }
 0x518   :  { %v360_v45 = vpop.eup %359 }
 0x519   :  { %v199_v46 = vadd.f32 1.0, %v360_v45 }
 0x51b   :  { %361 = vrcp.f32 %v199_v46 }
 0x525   :  { %v362_v48 = vpop.eup %361 }
 0x580   :  { %v205_v52 = vpop.permute.xlu1 %204 }
 0x581   :  { %v207_v53 = vmul.f32 %v362_v48, %v205_v52 }
 0x589   :  { %v210_v49 = vpop.permute.xlu0 %209 }
 0x58a   :  { %v212_v50 = vmul.f32 %v362_v48, %v210_v49 }
 0x58c   :  { %214 = vrot.lane.b32.xlu0 %v212_v50, %s378_s1 }
 0x590   :  { %224 = vrot.lane.b32.xlu0 %v454_v51, %s378_s1 }
 0x5fe   :  { %v215_v54 = vpop.permute.xlu0 %214 }
 0x5ff   :  { %v217_v55 = vadd.f32 %v215_v54, %v207_v53 }
 0x601   :  { %363 = vtanh.f32 %v217_v55 }
 0x602   :  { %v225_v61 = vpop.permute.xlu0 %224 }
 0x603   :  { %v227_v51 = vmul.f32 %v225_v61, %v415_v1 }
 0x60b   :  { %v364_v56 = vpop.eup %363 }
 0x60c   :  { %220 = vrot.lane.b32.xlu1 %v364_v56, %s380_s14 }
 0x67e   :  { %v221_v59 = vpop.permute.xlu1 %220 }
 0x67f   :  { %v223_v60 = vmul.f32 %v362_v48, %v221_v59 }
 0x681   :  { %229 = vrot.lane.b32.xlu1 %v223_v60, %s393_s19 }
 0x6f3   :  { %v230_v62 = vpop.permute.xlu1 %229 }
 0x6f4   :  { %v232_v63 = vmul.f32 %v230_v62, %v450_v47 }
 0x6f6   :  { %v233_v0 = vadd.f32 %v232_v63, %v227_v51 }
 0x6f8   :  { %242 = vperm.xlu1 %339, %v233_v0   ;;  %236 = vperm.xlu0 %338, %v233_v0  }
 0x6fc   :  { %169 = vrot.lane.b32.xlu0 %v470_v14, %s388_s16  ;;  %164 = vrot.lane.b32.xlu1 %v415_v1, %s394_s20  ;;  %v249_v14 = vmul.f32 %v483_v28, %v435_v20 }
 0x6fd   :  { %340 = vset.pattern.permute.xlu0 %v392_v58 }
 0x777   :  { %v243_v2 = vpop.permute.xlu1 %242  ;;  %v237_v3 = vpop.permute.xlu0 %236 }
 0x778   :  { %v239_v4 = vmul.f32 %v237_v3, %v426_v9  ;;  %v245_v5 = vmul.f32 %v243_v2, %v431_v18 }
 0x77a   :  { %v240_v6 = vadd.f32 %v239_v4, %v428_v16 }
 0x77b   :  { %v165_v7 = vpop.permute.xlu1 %164  ;;  %v170_v8 = vpop.permute.xlu0 %169 }
 0x77c   :  { %v246_v11 = vadd.f32 %v245_v5, %v240_v6  ;;  %v167_v12 = vmul.f32 %v165_v7, %v415_v1  ;;  %v172_v13 = vmul.f32 %v170_v8, %v450_v47 }
 0x77e   :  { %v248_v15 = vadd.f32 %v247_v10, %v246_v11  ;;  %v173_v17 = vadd.f32 %v172_v13, %v167_v12 }
 0x780   :  { %v250_v21 = vadd.f32 %v249_v14, %v248_v15  ;;  %259 = vrot.lane.b32.xlu0 %v173_v17, %s395_s21 }
 0x782   :  { %365 = vtanh.f32 %v250_v21  ;;  %v302_v16 = vmul.f32 -1.442695, %v250_v21 }
 0x784   :  { %367 = vpow2.f32 %v302_v16 }
 0x78c   :  { %v366_v9 = vpop.eup %365 }
 0x78d   :  { %264 = vrot.lane.b32.xlu1 %v366_v9, %s377_s11 }
 0x78e   :  { %v368_v18 = vpop.eup %367 }
 0x78f   :  { %v254_v19 = vadd.f32 1.0, %v368_v18 }
 0x791   :  { %369 = vrcp.f32 %v254_v19 }
 0x79b   :  { %v370_v22 = vpop.eup %369 }
 0x7f2   :  { %v260_v20 = vpop.permute.xlu0 %259 }
 0x7f3   :  { %v262_v25 = vmul.f32 %v370_v22, %v260_v20 }
 0x7ff   :  { %v265_v23 = vpop.permute.xlu1 %264 }
 0x800   :  { %v267_v24 = vmul.f32 %v370_v22, %v265_v23 }
 0x802   :  { %269 = vrot.lane.b32.xlu1 %v267_v24, %s378_s1 }
 0x806   :  { %279 = vrot.lane.b32.xlu1 %v476_v27, %s378_s1 }
 0x80a   :  { %175 = vrot.lane.b32.xlu1 %v476_v27, %s396_s22 }
 0x874   :  { %v270_v26 = vpop.permute.xlu1 %269 }
 0x875   :  { %v272_v28 = vadd.f32 %v270_v26, %v262_v25 }
 0x877   :  { %371 = vtanh.f32 %v272_v28 }
 0x878   :  { %v280_v29 = vpop.permute.xlu1 %279 }
 0x879   :  { %v282_v34 = vmul.f32 %v280_v29, %v415_v1 }
 0x87c   :  { %v176_v30 = vpop.permute.xlu1 %175 }
 0x87d   :  { %179 = vst.msk [vmem:[%s530_s2] sm:$0xf] %vm178_vm0, %v176_v30 }
 0x881   :  { %v372_v31 = vpop.eup %371 }
 0x882   :  { %275 = vrot.lane.b32.xlu0 %v372_v31, %s380_s14 }
 0x8f4   :  { %v276_v32 = vpop.permute.xlu0 %275 }
 0x8f5   :  { %v278_v33 = vmul.f32 %v370_v22, %v276_v32 }
 0x8f7   :  { %284 = vrot.lane.b32.xlu0 %v278_v33, %s378_s1 }
 0x969   :  { %v285_v27 = vpop.permute.xlu0 %284 }
 0x96a   :  { %v287_v35 = vmul.f32 %v285_v27, %v450_v47 }
 0x96c   :  { %v288_v36 = vadd.f32 %v287_v35, %v282_v34 }
 0x96e   :  { %290 = vrot.lane.b32.xlu0 %v288_v36, %s390_s18 }
 0x9e0   :  { %v291_v37 = vpop.permute.xlu0 %290 }
 0x9e1   :  { %303 = vst.msk [vmem:[%s530_s2 + $0x4] sm:$0xf] %vm178_vm0, %v291_v37 }

</bundles_post_ra>
